<compile_context>
chip_gen: v7x
topology: tpu7x:2x2x1
jax: 0.10.0
libtpu: 0.0.40
codegen_flags: <defaults>
</compile_context>

<pallas_src>
import jax
import jax.numpy as jnp
from jax.experimental import pallas as pl
from jax.experimental.pallas import tpu as pltpu

EPS = 1e-12  # F.normalize default eps


def fusion_kernel(text_ref, video_ref,
                  w_va1_ref, b_va1_ref, w_va2_ref,
                  w_v_ref, b_v_ref, w_t_ref, b_t_ref,
                  wap_ref, b_ap_ref,
                  out_ref):
    TB = text_ref.shape[0]
    TBF, Dv = video_ref.shape
    F = TBF // TB
    E = w_t_ref.shape[1]
    OUT_W = out_ref.shape[1]
    pad = OUT_W - 3 * E

    # ---------------- VideoAttentionPooling ----------------
    v2 = video_ref[...]                                                  # (TB*F, Dv)

    # Linear(Dv, 64) -> ReLU  (clean 2-D MXU matmul on the flat layout)
    h = jnp.dot(v2, w_va1_ref[...], preferred_element_type=jnp.float32) + b_va1_ref[...]
    h = jnp.maximum(h, 0.0)                                              # (TB*F, H)

    # Linear(64, 1) as a lane reduction; energies land lane-dense as (TB, F).
    # b_va2 is intentionally omitted: a constant added to all frame energies
    # cancels in the softmax.
    h3 = h.reshape(TB, F, -1)                                            # (TB, F, H)
    e = jnp.sum(h3 * w_va2_ref[...], axis=-1)                            # (TB, F)

    # softmax over the frame axis (lane axis), reciprocal on the EUP
    e = e - jnp.max(e, axis=-1, keepdims=True)
    p = jnp.exp(e)
    w_frames = p * pl.reciprocal(jnp.sum(p, axis=-1, keepdims=True), approx=True)

    # Weighted frame pooling (cross-sublane reduce; MXU is idle — if a bundle dump
    # shows the XLU slot binding at large TB, switch this to a per-row matmul).
    v3 = v2.reshape(TB, F, Dv)
    pooled = jnp.sum(v3 * w_frames[:, :, None], axis=1)                  # (TB, Dv)

    # ---------------- fc_v / fc_t + F.normalize (rsqrt on EUP) ----------------
    vfc = jnp.dot(pooled, w_v_ref[...], preferred_element_type=jnp.float32) + b_v_ref[...]
    vss = jnp.sum(vfc * vfc, axis=-1, keepdims=True)
    vn = vfc * jax.lax.rsqrt(jnp.maximum(vss, EPS * EPS))                # (TB, E)

    t = text_ref[...]                                                    # (TB, Dt)
    tfc = jnp.dot(t, w_t_ref[...], preferred_element_type=jnp.float32) + b_t_ref[...]
    tss = jnp.sum(tfc * tfc, axis=-1, keepdims=True)
    tn = tfc * jax.lax.rsqrt(jnp.maximum(tss, EPS * EPS))                # (TB, E)

    # ---------------- AttentionPooling over the 2 embeddings ----------------
    # energy[:, c] = tn @ w_ap[0:E, c] + vn @ w_ap[E:2E, c] + b_ap[c]
    # computed as lane reductions against the repacked (4, E) weight; b_ap comes
    # from SMEM as two scalars.
    wap = wap_ref[...]                                                   # (4, E)
    e0 = (jnp.sum(tn * wap[0:1, :], axis=-1, keepdims=True)
          + jnp.sum(vn * wap[1:2, :], axis=-1, keepdims=True) + b_ap_ref[0])
    e1 = (jnp.sum(tn * wap[2:3, :], axis=-1, keepdims=True)
          + jnp.sum(vn * wap[3:4, :], axis=-1, keepdims=True) + b_ap_ref[1])

    m = jnp.maximum(e0, e1)
    p0 = jnp.exp(e0 - m)
    p1 = jnp.exp(e1 - m)
    denom = p0 + p1
    a0 = p0 / denom      # exact divide on (TB,1): negligible cost, better parity
    a1 = p1 / denom

    fused = a0 * tn + a1 * vn                                            # (TB, E)
    fss = jnp.sum(fused * fused, axis=-1, keepdims=True)
    emb = fused * jax.lax.rsqrt(jnp.maximum(fss, EPS * EPS))

    # Single lane-dense store: [emb | text_norm | video_norm | zero-pad] (width
    # is a multiple of 128 lanes -> unmasked vst).
    parts = [emb, tn, vn]
    if pad:
        parts.append(jnp.zeros((TB, pad), jnp.float32))
    out_ref[...] = jnp.concatenate(parts, axis=-1)                       # (TB, OUT_W)


# ---------------------------------------------------------------------------
# VMEM budgeting helpers (lane/sublane-padding aware)
# ---------------------------------------------------------------------------
def _round_up(x, m):
    return (x + m - 1) // m * m


def _pad2(r, c):
    """f32 element count of an (r, c) tensor after (8, 128) tile padding."""
    return _round_up(max(r, 1), 8) * _round_up(max(c, 1), 128)


def _vmem_cap_bytes():
    """75% of the per-core VMEM capacity (v5e/v6e ~96 MiB, v7x ~48 MiB)."""
    try:
        info = pltpu.get_tpu_info()
        cap = getattr(info, "vmem_capacity_bytes", None)
        if cap:
            return int(cap * 0.75)
    except Exception:
        pass
    return 48 * 1024 * 1024  # v7x-safe fallback


def _vmem_need_bytes(TB, F, Dt, Dv, E, H, OUT_W):
    f32 = 4
    # double-buffered per-step I/O blocks
    io_blocks = 2 * f32 * (_pad2(TB, Dt) + _pad2(TB * F, Dv) + _pad2(TB, OUT_W))
    # VMEM-resident weights (conservatively counted double-buffered)
    weights = 2 * f32 * (_pad2(Dv, H) + 2 * _pad2(1, H) + _pad2(Dv, E) + _pad2(Dt, E)
                         + 2 * _pad2(1, E) + _pad2(4, E))
    # generous intermediates
    interm = f32 * (2 * _pad2(TB * F, H) + _pad2(TB * F, Dv) + _pad2(TB, Dv)
                    + 8 * _pad2(TB, E) + 4 * _pad2(TB, F) + 2 * _pad2(TB, OUT_W))
    return io_blocks + weights + interm


def _pick_tb(B, F, Dt, Dv, E, H, OUT_W, block_b, vmem_cap):
    """Largest multiple of 8 dividing B that fits the VMEM budget; grid >= 2 if B >= 16."""
    headroom = 8 * 1024 * 1024
    upper = min(block_b, B)
    if B >= 16:
        upper = min(upper, B // 2)   # keep >= 2 grid steps so v7x uses both cores
    cand = upper - (upper % 8)
    while cand >= 8:
        if B % cand == 0 and _vmem_need_bytes(cand, F, Dt, Dv, E, H, OUT_W) + headroom <= vmem_cap:
            return cand
        cand -= 8
    return B  # single full-array block (always legal)


# ---------------------------------------------------------------------------
# Wrapper
# ---------------------------------------------------------------------------
def base_doc_attention_fusion(text_emb, video_emb_flat, params, *, block_b=1024):
    """Returns (emb, text_emb_norm, video_emb_norm), matching the PyTorch module."""
    B, Dt = text_emb.shape
    BF, Dv = video_emb_flat.shape
    assert BF % B == 0, "video rows must be a multiple of the batch size"
    F = BF // B
    E = params["w_t"].shape[1]
    H = params["w_va1"].shape[1]
    OUT_W = _round_up(3 * E, 128)     # lane-dense output width

    vmem_cap = _vmem_cap_bytes()
    TB = _pick_tb(B, F, Dt, Dv, E, H, OUT_W, block_b, vmem_cap)
    grid = (B // TB,)

    # Repack the AttentionPooling projection weight (2E, 2) -> (4, E):
    #   row 0: w_ap[0:E,0], row 1: w_ap[E:2E,0], row 2: w_ap[0:E,1], row 3: w_ap[E:2E,1]
    wap_r = params["w_ap"].reshape(2, E, 2).transpose(2, 0, 1).reshape(4, E)
    b_ap = params["b_ap"].reshape(2).astype(jnp.float32)   # -> SMEM scalars

    tiled_inputs = (text_emb, video_emb_flat)
    vmem_weights = (params["w_va1"], params["b_va1"], params["w_va2"],
                    params["w_v"], params["b_v"], params["w_t"], params["b_t"],
                    wap_r)

    in_specs = (
        [pl.BlockSpec((TB, Dt), lambda i: (i, 0)),            # text block
         pl.BlockSpec((TB * F, Dv), lambda i: (i, 0))]        # flat video block
        + [pl.BlockSpec(w.shape, lambda i: (0, 0)) for w in vmem_weights]  # resident
        + [pl.BlockSpec(memory_space=pltpu.MemorySpace.SMEM)]               # b_ap scalars
    )

    need = _vmem_need_bytes(TB, F, Dt, Dv, E, H, OUT_W)
    vmem_limit = int(min(vmem_cap, max(32 * 1024 * 1024, need + (8 << 20))))

    out = pl.pallas_call(
        fusion_kernel,
        grid=grid,
        in_specs=in_specs,
        out_specs=pl.BlockSpec((TB, OUT_W), lambda i: (i, 0)),
        out_shape=jax.ShapeDtypeStruct((B, OUT_W), jnp.float32),
        compiler_params=pltpu.CompilerParams(
            dimension_semantics=("parallel",),
            vmem_limit_bytes=vmem_limit,
        ),
    )(*tiled_inputs, *vmem_weights, b_ap)

    emb = out[:, 0:E]
    tn = out[:, E:2 * E]
    vn = out[:, 2 * E:3 * E]
    return emb, tn, vn


def reference(text_emb, video_emb_flat, params):
    """Pure-JAX reference mirroring the PyTorch forward."""
    B = text_emb.shape[0]
    Dv = video_emb_flat.shape[1]
    v3 = video_emb_flat.reshape(B, -1, Dv)
    h = jnp.maximum(v3 @ params["w_va1"] + params["b_va1"][0], 0.0)
    e = jnp.sum(h * params["w_va2"][0], axis=-1) + params["b_va2"][0, 0]
    w = jax.nn.softmax(e, axis=1)
    pooled = jnp.sum(v3 * w[:, :, None], axis=1)

    def norm(x):
        return x / jnp.maximum(jnp.linalg.norm(x, axis=-1, keepdims=True), EPS)

    vn = norm(pooled @ params["w_v"] + params["b_v"][0])
    tn = norm(text_emb @ params["w_t"] + params["b_t"][0])
    concat = jnp.concatenate([tn, vn], axis=-1)
    aw = jax.nn.softmax(concat @ params["w_ap"] + params["b_ap"][0], axis=1)
    fused = aw[:, 0:1] * tn + aw[:, 1:2] * vn
    return norm(fused), tn, vn


if __name__ == "__main__":
    # small, forward-consistent shapes (input_dims = (Dt, _, Dv), emb_dim = E)
    B, F, Dt, Dv, E, H = 16, 8, 32, 48, 32, 64
    key = jax.random.PRNGKey(0)
    ks = jax.random.split(key, 12)

    params = {
        "w_va1": jax.random.normal(ks[0], (Dv, H), jnp.float32) * 0.1,
        "b_va1": jax.random.normal(ks[1], (1, H), jnp.float32) * 0.1,
        "w_va2": jax.random.normal(ks[2], (1, H), jnp.float32) * 0.1,
        "b_va2": jax.random.normal(ks[3], (1, 1), jnp.float32) * 0.1,  # cancels in softmax
        "w_v":   jax.random.normal(ks[4], (Dv, E), jnp.float32) * 0.1,
        "b_v":   jax.random.normal(ks[5], (1, E), jnp.float32) * 0.1,
        "w_t":   jax.random.normal(ks[6], (Dt, E), jnp.float32) * 0.1,
        "b_t":   jax.random.normal(ks[7], (1, E), jnp.float32) * 0.1,
        "w_ap":  jax.random.normal(ks[8], (2 * E, 2), jnp.float32) * 0.1,
        "b_ap":  jax.random.normal(ks[9], (1, 2), jnp.float32) * 0.1,
    }

    text_emb = jax.random.normal(ks[10], (B, Dt), jnp.float32)             # emb_list[0]
    video_emb_flat = jax.random.normal(ks[11], (B * F, Dv), jnp.float32)   # emb_list[1]

    # Default block_b: TB resolves to B//2 = 8 -> grid=(2,), so the batch pipelining
    # (and dual-core sharding on v7x) path is exercised.
    emb, tn, vn = base_doc_attention_fusion(text_emb, video_emb_flat, params)
    jax.block_until_ready((emb, tn, vn))

    r_emb, r_tn, r_vn = reference(text_emb, video_emb_flat, params)
    for got, want in ((emb, r_emb), (tn, r_tn), (vn, r_vn)):
        assert jnp.allclose(got, want, atol=2e-2, rtol=2e-2), "mismatch vs reference"

    print("KERNEL_OK")
</pallas_src>

<mosaic_0001>
module attributes {stable_mosaic.version = 11 : i64} {
  func.func @fusion_kernel(%arg0: i32, %arg1: memref<8x32xf32, #tpu.memory_space<vmem>>, %arg2: memref<64x48xf32, #tpu.memory_space<vmem>>, %arg3: memref<48x64xf32, #tpu.memory_space<vmem>>, %arg4: memref<1x64xf32, #tpu.memory_space<vmem>>, %arg5: memref<1x64xf32, #tpu.memory_space<vmem>>, %arg6: memref<48x32xf32, #tpu.memory_space<vmem>>, %arg7: memref<1x32xf32, #tpu.memory_space<vmem>>, %arg8: memref<32x32xf32, #tpu.memory_space<vmem>>, %arg9: memref<1x32xf32, #tpu.memory_space<vmem>>, %arg10: memref<4x32xf32, #tpu.memory_space<vmem>>, %arg11: memref<2xf32, #tpu.memory_space<smem>>, %arg12: memref<8x128xf32, #tpu.memory_space<vmem>>) attributes {dimension_semantics = [#tpu.dimension_semantics<parallel>], iteration_bounds = array<i64: 2>, scalar_prefetch = 0 : i64, scratch_operands = 0 : i64, tpu.core_type = #tpu.core_type<tc>, window_params = [{transform_indices = @transform_0, window_bounds = array<i64: 8, 32>}, {transform_indices = @transform_1, window_bounds = array<i64: 64, 48>}, {pipeline_mode = #tpu.pipeline_mode<synchronous>, transform_indices = @transform_2, window_bounds = array<i64: 48, 64>}, {pipeline_mode = #tpu.pipeline_mode<synchronous>, transform_indices = @transform_3, window_bounds = array<i64: 1, 64>}, {pipeline_mode = #tpu.pipeline_mode<synchronous>, transform_indices = @transform_4, window_bounds = array<i64: 1, 64>}, {pipeline_mode = #tpu.pipeline_mode<synchronous>, transform_indices = @transform_5, window_bounds = array<i64: 48, 32>}, {pipeline_mode = #tpu.pipeline_mode<synchronous>, transform_indices = @transform_6, window_bounds = array<i64: 1, 32>}, {pipeline_mode = #tpu.pipeline_mode<synchronous>, transform_indices = @transform_7, window_bounds = array<i64: 32, 32>}, {pipeline_mode = #tpu.pipeline_mode<synchronous>, transform_indices = @transform_8, window_bounds = array<i64: 1, 32>}, {pipeline_mode = #tpu.pipeline_mode<synchronous>, transform_indices = @transform_9, window_bounds = array<i64: 4, 32>}, {transform_indices = @transform_10, window_bounds = array<i64: 2>}, {transform_indices = @transform_11, window_bounds = array<i64: 8, 128>}]} {
    %c0 = arith.constant 0 : index
    %c0_0 = arith.constant 0 : index
    %0 = vector.load %arg2[%c0, %c0_0] : memref<64x48xf32, #tpu.memory_space<vmem>>, vector<64x48xf32>
    %c0_1 = arith.constant 0 : index
    %c0_2 = arith.constant 0 : index
    %1 = vector.load %arg3[%c0_1, %c0_2] : memref<48x64xf32, #tpu.memory_space<vmem>>, vector<48x64xf32>
    %cst = arith.constant dense<0.000000e+00> : vector<64x64xf32>
    %2 = tpu.matmul %0, %1, %cst {dimension_numbers = #tpu.dot_dimension_numbers<[1], [0], [0], [1], [0, 0, 1, 1], [], []>} : vector<64x48xf32>, vector<48x64xf32>, vector<64x64xf32> -> vector<64x64xf32>
    %c0_3 = arith.constant 0 : index
    %c0_4 = arith.constant 0 : index
    %3 = vector.load %arg4[%c0_3, %c0_4] : memref<1x64xf32, #tpu.memory_space<vmem>>, vector<1x64xf32>
    %4 = vector.broadcast %3 : vector<1x64xf32> to vector<64x64xf32>
    %5 = arith.addf %2, %4 : vector<64x64xf32>
    %cst_5 = arith.constant 0.000000e+00 : f32
    %6 = vector.broadcast %cst_5 : f32 to vector<64x64xf32>
    %7 = arith.maximumf %5, %6 : vector<64x64xf32>
    %8 = vector.shape_cast %7 : vector<64x64xf32> to vector<8x8x64xf32>
    %c0_6 = arith.constant 0 : index
    %c0_7 = arith.constant 0 : index
    %9 = vector.load %arg5[%c0_6, %c0_7] : memref<1x64xf32, #tpu.memory_space<vmem>>, vector<1x64xf32>
    %10 = vector.shape_cast %9 : vector<1x64xf32> to vector<1x1x64xf32>
    %11 = vector.broadcast %10 : vector<1x1x64xf32> to vector<8x8x64xf32>
    %12 = arith.mulf %8, %11 : vector<8x8x64xf32>
    %cst_8 = arith.constant dense<0.000000e+00> : vector<8x8xf32>
    %13 = vector.multi_reduction <add>, %12, %cst_8 [2] : vector<8x8x64xf32> to vector<8x8xf32>
    %cst_9 = arith.constant dense<0xFF800000> : vector<8xf32>
    %14 = vector.multi_reduction <maximumf>, %13, %cst_9 [1] : vector<8x8xf32> to vector<8xf32>
    %15 = vector.shape_cast %14 : vector<8xf32> to vector<8x1xf32>
    %16 = vector.broadcast %15 : vector<8x1xf32> to vector<8x8xf32>
    %17 = arith.subf %13, %16 : vector<8x8xf32>
    %18 = math.exp %17 : vector<8x8xf32>
    %cst_10 = arith.constant dense<0.000000e+00> : vector<8xf32>
    %19 = vector.multi_reduction <add>, %18, %cst_10 [1] : vector<8x8xf32> to vector<8xf32>
    %20 = vector.shape_cast %19 : vector<8xf32> to vector<8x1xf32>
    %21 = tpu.reciprocal %20 {approx = true} : vector<8x1xf32> -> vector<8x1xf32>
    %22 = vector.broadcast %21 : vector<8x1xf32> to vector<8x8xf32>
    %23 = arith.mulf %18, %22 : vector<8x8xf32>
    %24 = vector.shape_cast %0 : vector<64x48xf32> to vector<8x8x48xf32>
    %25 = vector.shape_cast %23 : vector<8x8xf32> to vector<8x8x1xf32>
    %26 = vector.broadcast %25 : vector<8x8x1xf32> to vector<8x8x48xf32>
    %27 = arith.mulf %24, %26 : vector<8x8x48xf32>
    %cst_11 = arith.constant dense<0.000000e+00> : vector<8x48xf32>
    %28 = vector.multi_reduction <add>, %27, %cst_11 [1] : vector<8x8x48xf32> to vector<8x48xf32>
    %c0_12 = arith.constant 0 : index
    %c0_13 = arith.constant 0 : index
    %29 = vector.load %arg6[%c0_12, %c0_13] : memref<48x32xf32, #tpu.memory_space<vmem>>, vector<48x32xf32>
    %cst_14 = arith.constant dense<0.000000e+00> : vector<8x32xf32>
    %30 = tpu.matmul %28, %29, %cst_14 {dimension_numbers = #tpu.dot_dimension_numbers<[1], [0], [0], [1], [0, 0, 1, 1], [], []>} : vector<8x48xf32>, vector<48x32xf32>, vector<8x32xf32> -> vector<8x32xf32>
    %c0_15 = arith.constant 0 : index
    %c0_16 = arith.constant 0 : index
    %31 = vector.load %arg7[%c0_15, %c0_16] : memref<1x32xf32, #tpu.memory_space<vmem>>, vector<1x32xf32>
    %32 = vector.broadcast %31 : vector<1x32xf32> to vector<8x32xf32>
    %33 = arith.addf %30, %32 : vector<8x32xf32>
    %34 = arith.mulf %33, %33 : vector<8x32xf32>
    %cst_17 = arith.constant dense<0.000000e+00> : vector<8xf32>
    %35 = vector.multi_reduction <add>, %34, %cst_17 [1] : vector<8x32xf32> to vector<8xf32>
    %36 = vector.shape_cast %35 : vector<8xf32> to vector<8x1xf32>
    %cst_18 = arith.constant 1.000000e-24 : f32
    %37 = vector.broadcast %cst_18 : f32 to vector<8x1xf32>
    %38 = arith.maximumf %36, %37 : vector<8x1xf32>
    %39 = math.rsqrt %38 : vector<8x1xf32>
    %40 = vector.broadcast %39 : vector<8x1xf32> to vector<8x32xf32>
    %41 = arith.mulf %33, %40 : vector<8x32xf32>
    %c0_19 = arith.constant 0 : index
    %c0_20 = arith.constant 0 : index
    %42 = vector.load %arg1[%c0_19, %c0_20] : memref<8x32xf32, #tpu.memory_space<vmem>>, vector<8x32xf32>
    %c0_21 = arith.constant 0 : index
    %c0_22 = arith.constant 0 : index
    %43 = vector.load %arg8[%c0_21, %c0_22] : memref<32x32xf32, #tpu.memory_space<vmem>>, vector<32x32xf32>
    %cst_23 = arith.constant dense<0.000000e+00> : vector<8x32xf32>
    %44 = tpu.matmul %42, %43, %cst_23 {dimension_numbers = #tpu.dot_dimension_numbers<[1], [0], [0], [1], [0, 0, 1, 1], [], []>} : vector<8x32xf32>, vector<32x32xf32>, vector<8x32xf32> -> vector<8x32xf32>
    %c0_24 = arith.constant 0 : index
    %c0_25 = arith.constant 0 : index
    %45 = vector.load %arg9[%c0_24, %c0_25] : memref<1x32xf32, #tpu.memory_space<vmem>>, vector<1x32xf32>
    %46 = vector.broadcast %45 : vector<1x32xf32> to vector<8x32xf32>
    %47 = arith.addf %44, %46 : vector<8x32xf32>
    %48 = arith.mulf %47, %47 : vector<8x32xf32>
    %cst_26 = arith.constant dense<0.000000e+00> : vector<8xf32>
    %49 = vector.multi_reduction <add>, %48, %cst_26 [1] : vector<8x32xf32> to vector<8xf32>
    %50 = vector.shape_cast %49 : vector<8xf32> to vector<8x1xf32>
    %cst_27 = arith.constant 1.000000e-24 : f32
    %51 = vector.broadcast %cst_27 : f32 to vector<8x1xf32>
    %52 = arith.maximumf %50, %51 : vector<8x1xf32>
    %53 = math.rsqrt %52 : vector<8x1xf32>
    %54 = vector.broadcast %53 : vector<8x1xf32> to vector<8x32xf32>
    %55 = arith.mulf %47, %54 : vector<8x32xf32>
    %c0_28 = arith.constant 0 : index
    %c0_29 = arith.constant 0 : index
    %56 = vector.load %arg10[%c0_28, %c0_29] : memref<4x32xf32, #tpu.memory_space<vmem>>, vector<4x32xf32>
    %57 = vector.extract_strided_slice %56 {offsets = [0, 0], sizes = [1, 32], strides = [1, 1]} : vector<4x32xf32> to vector<1x32xf32>
    %58 = vector.broadcast %57 : vector<1x32xf32> to vector<8x32xf32>
    %59 = arith.mulf %55, %58 : vector<8x32xf32>
    %cst_30 = arith.constant dense<0.000000e+00> : vector<8xf32>
    %60 = vector.multi_reduction <add>, %59, %cst_30 [1] : vector<8x32xf32> to vector<8xf32>
    %61 = vector.shape_cast %60 : vector<8xf32> to vector<8x1xf32>
    %62 = vector.extract_strided_slice %56 {offsets = [1, 0], sizes = [1, 32], strides = [1, 1]} : vector<4x32xf32> to vector<1x32xf32>
    %63 = vector.broadcast %62 : vector<1x32xf32> to vector<8x32xf32>
    %64 = arith.mulf %41, %63 : vector<8x32xf32>
    %cst_31 = arith.constant dense<0.000000e+00> : vector<8xf32>
    %65 = vector.multi_reduction <add>, %64, %cst_31 [1] : vector<8x32xf32> to vector<8xf32>
    %66 = vector.shape_cast %65 : vector<8xf32> to vector<8x1xf32>
    %67 = arith.addf %61, %66 : vector<8x1xf32>
    %c0_32 = arith.constant 0 : index
    %68 = memref.load %arg11[%c0_32] : memref<2xf32, #tpu.memory_space<smem>>
    %69 = vector.broadcast %68 : f32 to vector<8x1xf32>
    %70 = arith.addf %67, %69 : vector<8x1xf32>
    %71 = vector.extract_strided_slice %56 {offsets = [2, 0], sizes = [1, 32], strides = [1, 1]} : vector<4x32xf32> to vector<1x32xf32>
    %72 = vector.broadcast %71 : vector<1x32xf32> to vector<8x32xf32>
    %73 = arith.mulf %55, %72 : vector<8x32xf32>
    %cst_33 = arith.constant dense<0.000000e+00> : vector<8xf32>
    %74 = vector.multi_reduction <add>, %73, %cst_33 [1] : vector<8x32xf32> to vector<8xf32>
    %75 = vector.shape_cast %74 : vector<8xf32> to vector<8x1xf32>
    %76 = vector.extract_strided_slice %56 {offsets = [3, 0], sizes = [1, 32], strides = [1, 1]} : vector<4x32xf32> to vector<1x32xf32>
    %77 = vector.broadcast %76 : vector<1x32xf32> to vector<8x32xf32>
    %78 = arith.mulf %41, %77 : vector<8x32xf32>
    %cst_34 = arith.constant dense<0.000000e+00> : vector<8xf32>
    %79 = vector.multi_reduction <add>, %78, %cst_34 [1] : vector<8x32xf32> to vector<8xf32>
    %80 = vector.shape_cast %79 : vector<8xf32> to vector<8x1xf32>
    %81 = arith.addf %75, %80 : vector<8x1xf32>
    %c1 = arith.constant 1 : index
    %82 = memref.load %arg11[%c1] : memref<2xf32, #tpu.memory_space<smem>>
    %83 = vector.broadcast %82 : f32 to vector<8x1xf32>
    %84 = arith.addf %81, %83 : vector<8x1xf32>
    %85 = arith.maximumf %70, %84 : vector<8x1xf32>
    %86 = arith.subf %70, %85 : vector<8x1xf32>
    %87 = math.exp %86 : vector<8x1xf32>
    %88 = arith.subf %84, %85 : vector<8x1xf32>
    %89 = math.exp %88 : vector<8x1xf32>
    %90 = arith.addf %87, %89 : vector<8x1xf32>
    %91 = arith.divf %87, %90 : vector<8x1xf32>
    %92 = arith.divf %89, %90 : vector<8x1xf32>
    %93 = vector.broadcast %91 : vector<8x1xf32> to vector<8x32xf32>
    %94 = arith.mulf %93, %55 : vector<8x32xf32>
    %95 = vector.broadcast %92 : vector<8x1xf32> to vector<8x32xf32>
    %96 = arith.mulf %95, %41 : vector<8x32xf32>
    %97 = arith.addf %94, %96 : vector<8x32xf32>
    %98 = arith.mulf %97, %97 : vector<8x32xf32>
    %cst_35 = arith.constant dense<0.000000e+00> : vector<8xf32>
    %99 = vector.multi_reduction <add>, %98, %cst_35 [1] : vector<8x32xf32> to vector<8xf32>
    %100 = vector.shape_cast %99 : vector<8xf32> to vector<8x1xf32>
    %cst_36 = arith.constant 1.000000e-24 : f32
    %101 = vector.broadcast %cst_36 : f32 to vector<8x1xf32>
    %102 = arith.maximumf %100, %101 : vector<8x1xf32>
    %103 = math.rsqrt %102 : vector<8x1xf32>
    %104 = vector.broadcast %103 : vector<8x1xf32> to vector<8x32xf32>
    %105 = arith.mulf %97, %104 : vector<8x32xf32>
    %cst_37 = arith.constant 0.000000e+00 : f32
    %106 = vector.broadcast %cst_37 : f32 to vector<8x32xf32>
    %107 = tpu.concatenate %105, %55, %41, %106 in 1 : vector<8x32xf32>, vector<8x32xf32>, vector<8x32xf32>, vector<8x32xf32> -> vector<8x128xf32>
    %c0_38 = arith.constant 0 : index
    %c0_39 = arith.constant 0 : index
    %108 = vector.load %arg12[%c0_38, %c0_39] : memref<8x128xf32, #tpu.memory_space<vmem>>, vector<8x128xf32>
    tpu.vector_store %arg12[%c0_38, %c0_39], %107 {strides = array<i32>} : memref<8x128xf32, #tpu.memory_space<vmem>>, vector<8x128xf32>,
    return
  }
  func.func @transform_0(%arg0: i32) -> (i32, i32) {
    %c0_i32 = arith.constant 0 : i32
    %c0_i32_0 = arith.constant 0 : i32
    return %arg0, %c0_i32 : i32, i32
  }
  func.func @transform_1(%arg0: i32) -> (i32, i32) {
    %c0_i32 = arith.constant 0 : i32
    %c0_i32_0 = arith.constant 0 : i32
    return %arg0, %c0_i32 : i32, i32
  }
  func.func @transform_2(%arg0: i32) -> (i32, i32) {
    %c0_i32 = arith.constant 0 : i32
    %c0_i32_0 = arith.constant 0 : i32
    %c0_i32_1 = arith.constant 0 : i32
    return %c0_i32, %c0_i32_0 : i32, i32
  }
  func.func @transform_3(%arg0: i32) -> (i32, i32) {
    %c0_i32 = arith.constant 0 : i32
    %c0_i32_0 = arith.constant 0 : i32
    %c0_i32_1 = arith.constant 0 : i32
    return %c0_i32, %c0_i32_0 : i32, i32
  }
  func.func @transform_4(%arg0: i32) -> (i32, i32) {
    %c0_i32 = arith.constant 0 : i32
    %c0_i32_0 = arith.constant 0 : i32
    %c0_i32_1 = arith.constant 0 : i32
    return %c0_i32, %c0_i32_0 : i32, i32
  }
  func.func @transform_5(%arg0: i32) -> (i32, i32) {
    %c0_i32 = arith.constant 0 : i32
    %c0_i32_0 = arith.constant 0 : i32
    %c0_i32_1 = arith.constant 0 : i32
    return %c0_i32, %c0_i32_0 : i32, i32
  }
  func.func @transform_6(%arg0: i32) -> (i32, i32) {
    %c0_i32 = arith.constant 0 : i32
    %c0_i32_0 = arith.constant 0 : i32
    %c0_i32_1 = arith.constant 0 : i32
    return %c0_i32, %c0_i32_0 : i32, i32
  }
  func.func @transform_7(%arg0: i32) -> (i32, i32) {
    %c0_i32 = arith.constant 0 : i32
    %c0_i32_0 = arith.constant 0 : i32
    %c0_i32_1 = arith.constant 0 : i32
    return %c0_i32, %c0_i32_0 : i32, i32
  }
  func.func @transform_8(%arg0: i32) -> (i32, i32) {
    %c0_i32 = arith.constant 0 : i32
    %c0_i32_0 = arith.constant 0 : i32
    %c0_i32_1 = arith.constant 0 : i32
    return %c0_i32, %c0_i32_0 : i32, i32
  }
  func.func @transform_9(%arg0: i32) -> (i32, i32) {
    %c0_i32 = arith.constant 0 : i32
    %c0_i32_0 = arith.constant 0 : i32
    %c0_i32_1 = arith.constant 0 : i32
    return %c0_i32, %c0_i32_0 : i32, i32
  }
  func.func @transform_10(%arg0: i32) -> i32 {
    %c0_i32 = arith.constant 0 : i32
    %c0_i32_0 = arith.constant 0 : i32
    return %c0_i32 : i32
  }
  func.func @transform_11(%arg0: i32) -> (i32, i32) {
    %c0_i32 = arith.constant 0 : i32
    %c0_i32_0 = arith.constant 0 : i32
    return %arg0, %c0_i32 : i32, i32
  }
}

</mosaic_0001>

<bundles_post_ra>
// kernel: tpu_custom_call.1
= control target key start
LH: loop header
LB: loop body
LE: loop exit
PB: predicated region body
PF: predicated region fallthrough
CT: control target
= control target key end

     0   :  { %s2064_s0 = inlined_call_operand.vmem [shape: f32[16,32], index: 0, kind: input, shape index: {}]   ;;  %s2065_s1 = inlined_call_operand.vmem [shape: f32[128,48], index: 1, kind: input, shape index: {}]   ;;  %s2066_s2 = inlined_call_operand.vmem [shape: f32[48,64], index: 2, kind: input, shape index: {}]   ;;  %s2067_s3 = inlined_call_operand.vmem [shape: f32[1,64], index: 3, kind: input, shape index: {}]   ;;  %s2068_s4 = inlined_call_operand.vmem [shape: f32[1,64], index: 4, kind: input, shape index: {}]   ;;  %s2069_s5 = inlined_call_operand.vmem [shape: f32[48,32], index: 5, kind: input, shape index: {}]   ;;  %s2070_s6 = inlined_call_operand.vmem [shape: f32[1,32], index: 6, kind: input, shape index: {}]   ;;  %s2071_s7 = inlined_call_operand.vmem [shape: f32[32,32], index: 7, kind: input, shape index: {}]   ;;  %s2072_s8 = inlined_call_operand.vmem [shape: f32[1,32], index: 8, kind: input, shape index: {}]   ;;  %s2073_s9 = inlined_call_operand.vmem [shape: f32[4,32], index: 9, kind: input, shape index: {}]   ;;  %s2074_s10 = inlined_call_operand.vmem [shape: f32[2], index: 10, kind: input, shape index: {}]   ;;  %s2075_s11 = inlined_call_operand.hbm [shape: f32[16,128], index: 11, kind: output, shape index: {}]  }
   0x1   :  { %2076 = sst [smem:[#allocation8_spill]] %s2074_s10 }
   0x2   :  { %16 = vsyncpa [#allocation4], 0 }
   0x3   :  { %17 = vsyncpa [#allocation3], 0 }
   0x4   :  { %19 = vsyncpa [#allocation3 + $0x1], 0  ;;  %s1715_s17 = smov 0   ;;  %s1717_s18 = smov 0  }
   0x5   :  { %s1719_s19 = smov 0   ;;  %s1721_s20 = smov 0  }
   0x6 LB: > { %s1736_s21 = sadd.s32 4294967295, %s1645_s20   ;;  %s1344_s22 = sadd.s32 4294967294, %s1645_s20   ;;  %s1645_s20 = sphi %s1721_s20, %s2084_s20   ;;  %s1641_s19 = sphi %s1719_s19, %s2083_s19   ;;  %s1637_s18 = sphi %s1717_s18, %s2082_s18   ;;  %s1633_s17 = sphi %s1715_s17, %s2081_s17  }
   0x7   : > { %s1740_s23 = sadd.s32 1, %s1645_s20   ;;  %s273_s24 = sadd.s32 1, %s1641_s19 }
   0x8   : > { %s270_s25 = ssub.s32 %s1645_s20, %s1740_s23  ;;  %p283_p0 = scmp.ne.s32.totalorder %s1641_s19, %s1637_s18 }
   0x9   : > { %p271_p1 = scmp.eq.s32.totalorder %s270_s25, 0  ;;  %p284_p2 = scmp.eq.s32.totalorder %s1736_s21, 1 }
   0xa   : > { %p289_p3 = scmp.ne.s32.totalorder %s1637_s18, %s1633_s17  ;;  %p290_p4 = scmp.eq.s32.totalorder %s1344_s22, 1 }
   0xb   : > { %s1751_s26 = scalar_select %p271_p1, %s1641_s19, %s273_s24  }
   0xc   : > { %p1753_p5 = por %p284_p2, %p283_p0  ;;  %p1757_p6 = por %p290_p4, %p289_p3 }
   0xd   : > { %p1345_p7 = scmp.ge.s32.totalorder %s1645_s20, 1  ;;  %p297_p8 = scmp.lt.s32.totalorder %s1645_s20, 3 }
   0xe   : > { %p1490_p9 = scmp.eq.s32.totalorder %s1736_s21, 0  ;;  %s2080_s10 = sld [smem:[#allocation8_spill]] }
   0xf   : > { %p1764_p10 = pnand %p1345_p7, %p297_p8 }
  0x11   : > { %p1482_p11 = pneg %p1764_p10 }
  0x13   : > { %p1483_p12 = pnand %p1490_p9, %p1482_p11 }
  0x14   : > { %s334_s13 = sshll.u32 %s2080_s10, 4  ;;  %s335_s13 = int_to_ptr.vmem [resolvable:$true] %s334_s13 }
  0x15   : > { %s1564_s14 = scalar_lea.vmem %s335_s13, 16  ;;  %p1566_p0 = pneg %p1483_p12 }
  0x16   : > { %p1565_p13 = scmp.ne.s32.totalorder %s335_s13, %s1564_s14  ;;  %p1572_p3 = scmp.lt.s32.totalorder %s335_s13, %s335_s13 }
  0x17   : > { %p1573_p4 = scmp.lt.s32.totalorder %s1564_s14, %s1564_s14 }
  0x18   : > { %p1567_p1 = pnand %p1566_p0, %p1565_p13 }
  0x19   : > { %p1574_p7 = por %p1573_p4, %p1572_p3 }
  0x1a   : > { %p1568_p2 = pneg %p1567_p1 }
  0x1c   : > { %p1575_p8 = pnand %p1574_p7, %p1568_p2 }
  0x1e   : > { %1578 = shalt.err (!%p1575_p8)
}
  0x1f   : > { %s1647_s15 = smov [#allocation2]   ;;  %363 = sbr.rel (%p1764_p10) target bundleno = 1834 (0x72a), region = 64 }
  0x20   : > { %1485 = dma.vmem_to_smem (!%p1483_p12), %s335_s13, 16, %s1647_s15, [#allocation4]  }
  0x26   : > { %1624 = dma.done.wait (%p1490_p9), [#allocation4], 16  }
  0x27   : > { %1626 = vsyncadd (%p1490_p9), [#allocation4], 4294967280 }
  0x28   : > { %369 = sfence }
  0x29   : > { %v426_v0 = vld [vmem:[%s2066_s2] sm:$0xff]  ;;  %v427_v1 = vld [vmem:[%s2066_s2 + $0x8] sm:$0xff]  ;;  %v428_v2 = vld [vmem:[%s2066_s2 + $0x10] sm:$0xff]  ;;  %s1352_s29 = sshll.u32 %s1736_s21, 3  ;;  %vm439_vm0 = vcmask 392192   ;;  %vm592_vm1 = vcmask 523264   ;;  %v625_v59 = vlaneseq }
  0x2a   : > { %v1449_v3 = vpack.c.bf16 %v427_v1, %v426_v0  ;;  %v429_v4 = vld [vmem:[%s2066_s2 + $0x18] sm:$0xff]  ;;  %p413_p9 = scmp.lt.s32.totalorder %s1352_s29, 15  ;;  %v430_v6 = vld [vmem:[%s2066_s2 + $0x20] sm:$0xff]  ;;  %v431_v7 = vld [vmem:[%s2066_s2 + $0x28] sm:$0xff]  ;;  %vm659_vm2 = vcmask 1041409   ;;  %vm661_vm3 = vcmask 1042434  }
  0x2b   : > { %v1453_v5 = vpack.c.bf16 %v429_v4, %v428_v2  ;;  %v1457_v8 = vpack.c.bf16 %v431_v7, %v430_v6  ;;  %v1354_v17 = vld [vmem:[%s2067_s3] ss:$0 sm:$0xff]  ;;  %v626_v60 = vand.u32 127, %v625_v59  ;;  %v1849_v61 = vshrl.u32 %v625_v59, 7  ;;  %p408_p10 = scmp.lt.s32.totalorder %s1736_s21, 1  ;;  %s1652_s13 = smov 64  }
  0x2c   : > { %1450 = vmatprep.subr.bf16.mxu0 %v1449_v3  ;;  %s2086_s29 = smov (!%p413_p9, %s1352_s29), 15  ;;  %v1363_v22 = vld [vmem:[%s2068_s4] ss:$0 sm:$0xff]  ;;  %vm663_vm4 = vcmask 1043459   ;;  %vm665_vm5 = vcmask 1044484   ;;  %vm667_vm6 = vcmask 1045509  }
  0x2d   : > { %1452 = vmatpush3.bf16.msra.mxu0 %v1449_v3  ;;  %s1353_s24 = sshll.u32 %s2086_s29, 3  ;;  %v1852_v63 = vsub.s32 %v626_v60, %v1849_v61  ;;  %vm669_vm7 = vcmask 1046534   ;;  %vm671_vm8 = vcmask 1047559   ;;  %vm674_vm9 = vcmask 64512   ;;  %s1368_s15 = sld [smem:[#allocation2 + $0x1]] }
  0x2e   : > { %1454 = vmatprep.subr.bf16.mxu0 %v1453_v5  ;;  %s416_s12 = scalar_lea.vmem %s2065_s1, %s1353_s24  ;;  %vm1650_vm10 = vmmov 0   ;;  %vm1073_vm11 = vcmask 261120   ;;  %s1653_s16 = smov 32   ;;  %vm1244_vm12 = vcmask 785408  }
  0x2f   : > { %v1803_v9 = vld [vmem:[%s416_s12] sm:$0xff]  ;;  %v1807_v10 = vld [vmem:[%s416_s12 + $0x8] sm:$0xff]  ;;  %v1809_v11 = vld [vmem:[%s416_s12 + $0x10] sm:$0xff]  ;;  %s409_s30 = scalar_select %p408_p10, %s1736_s21, 1 }
  0x30   : > { %1411 = vmatprep.mubr.msk.f32.mxu0 %vm439_vm0, %v1803_v9  ;;  %v1815_v12 = vld [vmem:[%s416_s12 + $0x18] sm:$0xff]  ;;  %v1817_v13 = vld [vmem:[%s416_s12 + $0x20] sm:$0xff]  ;;  %v1823_v14 = vld [vmem:[%s416_s12 + $0x28] sm:$0xff]  ;;  %s1370_s25 = sshll.u32 %s1736_s21, 7 }
  0x31   : > { %1456 = vmatpush3.bf16.msra.mxu0 %v1453_v5  ;;  %v1825_v15 = vld [vmem:[%s416_s12 + $0x30] sm:$0xff]  ;;  %v1831_v16 = vld [vmem:[%s416_s12 + $0x38] sm:$0xff]  ;;  %s1351_s14 = sshll.u32 %s409_s30, 3 }
  0x32   : > { %1458 = vmatprep.subr.bf16.mxu0 %v1457_v8  ;;  %s411_s22 = scalar_lea.vmem %s2064_s0, %s1351_s14  ;;  %s1190_s14 = sld [smem:[#allocation2]] }
  0x35   : > { %1460 = vmatpush3.bf16.msra.mxu0 %v1457_v8 }
  0x38   : > { %1412 = vmatmul.mubr.msk.f32.vlgmr.msra.gmra.mrb[0].mxu0 %vm439_vm0, %v1807_v10 }
  0x39   : > { %1414 = vmatprep.mubr.msk.f32.mxu0 %vm439_vm0, %v1809_v11 }
  0x3c   : > { %1415 = vmatmul.mubr.msk.f32.gmra.mrb[2].mxu0 %vm439_vm0, %v1815_v12 }
  0x3d   : > { %1417 = vmatprep.mubr.msk.f32.mxu0 %vm439_vm0, %v1817_v13 }
  0x40   : > { %1418 = vmatmul.mubr.msk.f32.gmra.mrb[4].mxu0 %vm439_vm0, %v1823_v14 }
  0x41   : > { %1420 = vmatprep.mubr.msk.f32.mxu0 %vm439_vm0, %v1825_v15 }
  0x44   : > { %1421 = vmatmul.mubr.msk.f32.gmra.mrb[6].mxu0 %vm439_vm0, %v1831_v16 }
 0x10b   : > { %v1413_v18 = vpop.f32.mrb[0].mxu0 }
 0x10c   : > { %v536_v19 = vadd.f32 %v1413_v18, %v1354_v17  ;;  %v530_v20 = vpop.f32.mrb[1].mxu0 }
 0x10d   : > { %v531_v21 = vadd.f32 %v1354_v17, %v530_v20 }
 0x10e   : > { %v570_v23 = vmax.f32 %v536_v19, 0.0 }
 0x10f   : > { %v569_v24 = vmax.f32 %v531_v21, 0.0  ;;  %v1416_v25 = vpop.f32.mrb[2].mxu0 }
 0x110   : > { %v546_v26 = vadd.f32 %v1416_v25, %v1354_v17  ;;  %v540_v27 = vpop.f32.mrb[3].mxu0  ;;  %v585_v28 = vmul.f32 %v1363_v22, %v570_v23 }
 0x111   : > { %v541_v29 = vadd.f32 %v1354_v17, %v540_v27  ;;  %v584_v32 = vmul.f32 %v1363_v22, %v569_v24 }
 0x112   : > { %v572_v30 = vmax.f32 %v546_v26, 0.0  ;;  %v596_v31 = vsel %vm592_vm1, %v585_v28, 0.0 }
 0x113   : > { %v571_v33 = vmax.f32 %v541_v29, 0.0  ;;  %597 = vadd.xlane.f32.xlu0 %v596_v31  ;;  %v1419_v34 = vpop.f32.mrb[4].mxu0  ;;  %v593_v41 = vsel %vm592_vm1, %v584_v32, 0.0  ;;  %v1648_v31 = vmov 0   ;;  %v1871_v32 = vsub.s32 0, %v1849_v61 }
 0x114   : > { %v556_v35 = vadd.f32 %v1419_v34, %v1354_v17  ;;  %v550_v36 = vpop.f32.mrb[5].mxu0  ;;  %v587_v37 = vmul.f32 %v1363_v22, %v572_v30  ;;  %1533 = vset.pattern.permute.xlu0 %v1648_v31  ;;  %1532 = vset.pattern.permute.xlu1 %v1648_v31  ;;  %v1877_v34 = vsub.s32 2, %v1849_v61 }
 0x115   : > { %v551_v38 = vadd.f32 %v1354_v17, %v550_v36  ;;  %v586_v42 = vmul.f32 %v1363_v22, %v571_v33  ;;  %v1874_v33 = vsub.s32 1, %v1849_v61 }
 0x116   : > { %v574_v39 = vmax.f32 %v556_v35, 0.0  ;;  %v602_v40 = vsel %vm592_vm1, %v587_v37, 0.0  ;;  %v1880_v35 = vsub.s32 3, %v1849_v61 }
 0x117   : > { %v573_v43 = vmax.f32 %v551_v38, 0.0  ;;  %603 = vadd.xlane.f32.xlu1 %v602_v40  ;;  %v1422_v44 = vpop.f32.mrb[6].mxu0  ;;  %594 = vadd.xlane.f32.xlu0 %v593_v41  ;;  %v599_v50 = vsel %vm592_vm1, %v586_v42, 0.0  ;;  %v697_v40 = vsub.s32 4, %v1849_v61 }
 0x118   : > { %v566_v45 = vadd.f32 %v1422_v44, %v1354_v17  ;;  %v560_v46 = vpop.f32.mrb[7].mxu0  ;;  %v589_v51 = vmul.f32 %v1363_v22, %v574_v39 }
 0x119   : > { %v561_v47 = vadd.f32 %v1354_v17, %v560_v46  ;;  %v588_v48 = vmul.f32 %v1363_v22, %v573_v43 }
 0x11a   : > { %v576_v49 = vmax.f32 %v566_v45, 0.0  ;;  %v608_v55 = vsel %vm592_vm1, %v589_v51, 0.0  ;;  %v705_v51 = vsub.s32 6, %v1849_v61 }
 0x11b   : > { %v575_v52 = vmax.f32 %v561_v47, 0.0  ;;  %600 = vadd.xlane.f32.xlu1 %v599_v50  ;;  %v605_v53 = vsel %vm592_vm1, %v588_v48, 0.0  ;;  %v701_v47 = vsub.s32 5, %v1849_v61 }
 0x11c   : > { %606 = vadd.xlane.f32.xlu0 %v605_v53  ;;  %v591_v56 = vmul.f32 %v1363_v22, %v576_v49 }
 0x11d   : > { %v590_v54 = vmul.f32 %v1363_v22, %v575_v52 }
 0x11e   : > { %v614_v58 = vsel %vm592_vm1, %v591_v56, 0.0 }
 0x11f   : > { %609 = vadd.xlane.f32.xlu1 %v608_v55  ;;  %v611_v57 = vsel %vm592_vm1, %v590_v54, 0.0  ;;  %v709_v55 = vsub.s32 7, %v1849_v61  ;;  %v974_v61 = vld [vmem:[%s2069_s5 + $0x10] sm:$0xff] }
 0x120   : > { %612 = vadd.xlane.f32.xlu0 %v611_v57 }
 0x123   : > { %615 = vadd.xlane.f32.xlu1 %v614_v58 }
 0x1a0   : > { %v598_v62 = vpop.xlane.xlu0 %597 }
 0x1a1   : > { %v634_v3 = vrot.slane %v598_v62, %v1852_v63 }
 0x1a4   : > { %v604_v0 = vpop.xlane.xlu1 %603  ;;  %v595_v1 = vpop.xlane.xlu0 %594 }
 0x1a5   : > { %v630_v2 = vrot.slane %v595_v1, %v1852_v63  ;;  %v642_v7 = vrot.slane %v604_v0, %v1852_v63 }
 0x1a7   : > { %v660_v8 = vsel %vm659_vm2, %v634_v3, %v630_v2 }
 0x1a8   : > { %v601_v4 = vpop.xlane.xlu1 %600 }
 0x1a9   : > { %v638_v5 = vrot.slane %v601_v4, %v1852_v63  ;;  %v607_v6 = vpop.xlane.xlu0 %606 }
 0x1aa   : > { %v646_v17 = vrot.slane %v607_v6, %v1852_v63 }
 0x1ab   : > { %v662_v18 = vsel %vm661_vm3, %v638_v5, %v660_v8 }
 0x1ac   : > { %v664_v19 = vsel %vm663_vm4, %v642_v7, %v662_v18  ;;  %v610_v20 = vpop.xlane.xlu1 %609 }
 0x1ad   : > { %v666_v21 = vsel %vm665_vm5, %v646_v17, %v664_v19  ;;  %v650_v22 = vrot.slane %v610_v20, %v1852_v63  ;;  %v613_v23 = vpop.xlane.xlu0 %612 }
 0x1ae   : > { %v654_v24 = vrot.slane %v613_v23, %v1852_v63 }
 0x1af   : > { %v668_v25 = vsel %vm667_vm6, %v650_v22, %v666_v21 }
 0x1b0   : > { %v616_v26 = vpop.xlane.xlu1 %615  ;;  %v670_v28 = vsel %vm669_vm7, %v654_v24, %v668_v25 }
 0x1b1   : > { %v658_v27 = vrot.slane %v616_v26, %v1852_v63 }
 0x1b3   : > { %v672_v29 = vsel %vm671_vm8, %v658_v27, %v670_v28 }
 0x1b4   : > { %v675_v30 = vsel %vm674_vm9, %v672_v29, -inf }
 0x1b5   : > { %676 = vmax.xlane.f32.xlu0 %v675_v30 }
 0x242   : > { %v677_v36 = vpop.xlane.xlu0 %676 }
 0x243   : > { %v682_v37 = vrot.slane %v677_v36, %v1871_v32  ;;  %v686_v38 = vrot.slane %v677_v36, %v1874_v33  ;;  %v690_v39 = vrot.slane %v677_v36, %v1877_v34  ;;  %v694_v41 = vrot.slane %v677_v36, %v1880_v35 }
 0x244   : > { %v698_v48 = vrot.slane %v677_v36, %v697_v40  ;;  %v702_v52 = vrot.slane %v677_v36, %v701_v47  ;;  %v706_v56 = vrot.slane %v677_v36, %v705_v51 }
 0x245   : > { %v719_v42 = vsub.f32 %v595_v1, %v682_v37  ;;  %v720_v43 = vsub.f32 %v598_v62, %v686_v38  ;;  %v721_v44 = vsub.f32 %v601_v4, %v690_v39  ;;  %v722_v49 = vsub.f32 %v604_v0, %v694_v41 }
 0x246   : > { %v723_v53 = vsub.f32 %v607_v6, %v698_v48  ;;  %v724_v57 = vsub.f32 %v610_v20, %v702_v52  ;;  %v710_v62 = vrot.slane %v677_v36, %v709_v55  ;;  %v725_v0 = vsub.f32 %v613_v23, %v706_v56 }
 0x247   : > { %v727_v45 = vmul.f32 1.442695, %v719_v42  ;;  %v729_v46 = vmul.f32 1.442695, %v720_v43  ;;  %v731_v50 = vmul.f32 1.442695, %v721_v44 }
 0x248   : > { %v733_v54 = vmul.f32 1.442695, %v722_v49  ;;  %v735_v58 = vmul.f32 1.442695, %v723_v53  ;;  %v737_v1 = vmul.f32 1.442695, %v724_v57  ;;  %v726_v3 = vsub.f32 %v616_v26, %v710_v62 }
 0x249   : > { %1534 = vpow2.f32 %v727_v45  ;;  %v739_v4 = vmul.f32 1.442695, %v725_v0 }
 0x24a   : > { %1536 = vpow2.f32 %v729_v46  ;;  %v741_v6 = vmul.f32 1.442695, %v726_v3 }
 0x24b   : > { %1538 = vpow2.f32 %v731_v50 }
 0x24c   : > { %1540 = vpow2.f32 %v733_v54 }
 0x24d   : > { %1542 = vpow2.f32 %v735_v58 }
 0x24e   : > { %1544 = vpow2.f32 %v737_v1 }
 0x24f   : > { %1546 = vpow2.f32 %v739_v4 }
 0x250   : > { %1548 = vpow2.f32 %v741_v6 }
 0x253   : > { %v1535_v59 = vpop.eup %1534 }
 0x254   : > { %v1537_v60 = vpop.eup %1536  ;;  %752 = vperm.xlu1 %1532, %v1535_v59  }
 0x255   : > { %755 = vperm.xlu0 %1533, %v1537_v60   ;;  %v1539_v2 = vpop.eup %1538 }
 0x256   : > { %v1541_v5 = vpop.eup %1540 }
 0x257   : > { %v1543_v7 = vpop.eup %1542 }
 0x258   : > { %758 = vperm.xlu1 %1532, %v1539_v2   ;;  %v1545_v8 = vpop.eup %1544 }
 0x259   : > { %v1547_v17 = vpop.eup %1546 }
 0x25a   : > { %v1549_v18 = vpop.eup %1548 }
 0x25c   : > { %761 = vperm.xlu1 %1532, %v1541_v5  }
 0x260   : > { %764 = vperm.xlu1 %1532, %v1543_v7  }
 0x264   : > { %767 = vperm.xlu1 %1532, %v1545_v8  }
 0x268   : > { %770 = vperm.xlu1 %1532, %v1547_v17  }
 0x26c   : > { %773 = vperm.xlu1 %1532, %v1549_v18  }
 0x2d3   : > { %v753_v19 = vpop.permute.xlu1 %752 }
 0x2d4   : > { %v756_v23 = vpop.permute.xlu0 %755  ;;  %v778_v26 = vrot.slane %v753_v19, %v1852_v63 }
 0x2d5   : > { %v782_v25 = vrot.slane %v756_v23, %v1852_v63 }
 0x2d7   : > { %v759_v20 = vpop.permute.xlu1 %758  ;;  %v807_v31 = vsel %vm659_vm2, %v782_v25, %v778_v26 }
 0x2d8   : > { %v786_v27 = vrot.slane %v759_v20, %v1852_v63 }
 0x2da   : > { %v808_v37 = vsel %vm661_vm3, %v786_v27, %v807_v31 }
 0x2db   : > { %v762_v21 = vpop.permute.xlu1 %761 }
 0x2dc   : > { %v790_v28 = vrot.slane %v762_v21, %v1852_v63 }
 0x2de   : > { %v809_v39 = vsel %vm663_vm4, %v790_v28, %v808_v37 }
 0x2df   : > { %v765_v22 = vpop.permute.xlu1 %764 }
 0x2e0   : > { %v794_v29 = vrot.slane %v765_v22, %v1852_v63 }
 0x2e2   : > { %v810_v41 = vsel %vm665_vm5, %v794_v29, %v809_v39 }
 0x2e3   : > { %v768_v24 = vpop.permute.xlu1 %767 }
 0x2e4   : > { %v798_v36 = vrot.slane %v768_v24, %v1852_v63 }
 0x2e6   : > { %v811_v43 = vsel %vm667_vm6, %v798_v36, %v810_v41 }
 0x2e7   : > { %v771_v30 = vpop.permute.xlu1 %770 }
 0x2e8   : > { %v802_v38 = vrot.slane %v771_v30, %v1852_v63 }
 0x2ea   : > { %v812_v45 = vsel %vm669_vm7, %v802_v38, %v811_v43 }
 0x2eb   : > { %v774_v42 = vpop.permute.xlu1 %773 }
 0x2ec   : > { %v806_v44 = vrot.slane %v774_v42, %v1852_v63 }
 0x2ee   : > { %v813_v46 = vsel %vm671_vm8, %v806_v44, %v812_v45 }
 0x2ef   : > { %v815_v48 = vsel %vm674_vm9, %v813_v46, 0.0 }
 0x2f0   : > { %816 = vadd.xlane.f32.xlu1 %v815_v48 }
 0x37d   : > { %v817_v49 = vpop.xlane.xlu1 %816 }
 0x37e   : > { %1550 = vrcp.f32 %v817_v49 }
 0x388   : > { %v1551_v50 = vpop.eup %1550 }
 0x389   : > { %v823_v52 = vrot.slane %v1551_v50, %v1871_v32  ;;  %v827_v54 = vrot.slane %v1551_v50, %v1874_v33  ;;  %v831_v57 = vrot.slane %v1551_v50, %v1877_v34  ;;  %v835_v58 = vrot.slane %v1551_v50, %v1880_v35 }
 0x38a   : > { %v839_v0 = vrot.slane %v1551_v50, %v697_v40  ;;  %v972_v40 = vld [vmem:[%s2069_s5] sm:$0xff] }
 0x38b   : > { %v860_v53 = vmul.f32 %v1535_v59, %v823_v52  ;;  %v861_v56 = vmul.f32 %v1537_v60, %v827_v54  ;;  %v862_v63 = vmul.f32 %v1539_v2, %v831_v57  ;;  %v863_v62 = vmul.f32 %v1541_v5, %v835_v58 }
 0x38c   : > { %v864_v1 = vmul.f32 %v1543_v7, %v839_v0  ;;  %v843_v59 = vrot.slane %v1551_v50, %v701_v47  ;;  %v847_v60 = vrot.slane %v1551_v50, %v705_v51  ;;  %v851_v2 = vrot.slane %v1551_v50, %v709_v55  ;;  %v973_v47 = vld [vmem:[%s2069_s5 + $0x8] sm:$0xff]  ;;  %v975_v51 = vld [vmem:[%s2069_s5 + $0x18] sm:$0xff] }
 0x38d   : > { %870 = vperm.xlu0 %1533, %v860_v53   ;;  %v1462_v6 = vpack.c.bf16 %v973_v47, %v972_v40  ;;  %v1649_v7 = vmov 0.0|0.0   ;;  %v1465_v55 = vpack.c.bf16 %v975_v51, %v974_v61 }
 0x38e   : > { %v865_v3 = vmul.f32 %v1545_v8, %v843_v59  ;;  %v866_v4 = vmul.f32 %v1547_v17, %v847_v60  ;;  %v867_v5 = vmul.f32 %v1549_v18, %v851_v2  ;;  %1461 = vmatprep.subr.bf16.mxu1 %v1649_v7  ;;  %v976_v8 = vld [vmem:[%s2069_s5 + $0x20] sm:$0xff]  ;;  %v977_v17 = vld [vmem:[%s2069_s5 + $0x28] sm:$0xff]  ;;  %v1651_v18 = vmov 0.0  }
 0x38f   : > { %1463 = vmatpush3.bf16.msra.mxu1 %v1462_v6  ;;  %1435 = vmatprep.mubr.msk.f32.mxu1 %vm1650_vm10, %v1651_v18  ;;  %v1468_v19 = vpack.c.bf16 %v977_v17, %v976_v8 }
 0x390   : > { %1464 = vmatprep.subr.bf16.mxu1 %v1649_v7 }
 0x391   : > { %875 = vperm.xlu0 %1533, %v861_v56  }
 0x393   : > { %1466 = vmatpush3.bf16.msra.mxu1 %v1465_v55 }
 0x394   : > { %1467 = vmatprep.subr.bf16.mxu1 %v1649_v7 }
 0x395   : > { %880 = vperm.xlu0 %1533, %v862_v63  }
 0x397   : > { %1469 = vmatpush3.bf16.msra.mxu1 %v1468_v19 }
 0x398   : > { %1470 = vmatprep.subr.bf16.mxu1 %v1649_v7 }
 0x399   : > { %885 = vperm.xlu0 %1533, %v863_v62  }
 0x39d   : > { %890 = vperm.xlu0 %1533, %v864_v1  }
 0x3a1   : > { %895 = vperm.xlu0 %1533, %v865_v3  }
 0x3a5   : > { %900 = vperm.xlu0 %1533, %v866_v4  }
 0x3a9   : > { %905 = vperm.xlu0 %1533, %v867_v5  }
 0x40c   : > { %v871_v20 = vpop.permute.xlu0 %870 }
 0x40d   : > { %v908_v24 = vmul.f32 %v871_v20, %v1803_v9 }
 0x40f   : > { %v916_v29 = vsel %vm439_vm0, %v908_v24, 0.0 }
 0x410   : > { %v876_v21 = vpop.permute.xlu0 %875  ;;  %v917_v38 = vrot.slane %v916_v29, 4 }
 0x411   : > { %v909_v22 = vmul.f32 %v876_v21, %v1807_v10 }
 0x412   : > { %v918_v43 = vadd.f32 %v917_v38, %v916_v29  ;;  %v1081_v38 = vld [vmem:[%s2071_s7] sm:$0xff] }
 0x413   : > { %v923_v26 = vsel %vm439_vm0, %v909_v22, 0.0 }
 0x414   : > { %v881_v23 = vpop.permute.xlu0 %880  ;;  %v924_v31 = vrot.slane %v923_v26, 4  ;;  %v919_v53 = vrot.slane %v918_v43, 2 }
 0x415   : > { %v910_v25 = vmul.f32 %v881_v23, %v1809_v11 }
 0x416   : > { %v925_v41 = vadd.f32 %v924_v31, %v923_v26  ;;  %v920_v59 = vadd.f32 %v919_v53, %v918_v43 }
 0x417   : > { %v930_v27 = vsel %vm439_vm0, %v910_v25, 0.0 }
 0x418   : > { %v886_v28 = vpop.permute.xlu0 %885  ;;  %v931_v36 = vrot.slane %v930_v27, 4  ;;  %v921_v51 = vrot.slane %v920_v59, 1 }
 0x419   : > { %v911_v30 = vmul.f32 %v886_v28, %v1815_v12  ;;  %v926_v12 = vrot.slane %v925_v41, 2 }
 0x41a   : > { %v932_v11 = vadd.f32 %v931_v36, %v930_v27  ;;  %v922_v25 = vadd.f32 %v921_v51, %v920_v59 }
 0x41b   : > { %v937_v37 = vsel %vm439_vm0, %v911_v30, 0.0  ;;  %v927_v58 = vadd.f32 %v926_v12, %v925_v41 }
 0x41c   : > { %v938_v10 = vrot.slane %v937_v37, 4  ;;  %v891_v39 = vpop.permute.xlu0 %890  ;;  %v933_v50 = vrot.slane %v932_v11, 2 }
 0x41d   : > { %v912_v9 = vmul.f32 %v891_v39, %v1817_v13  ;;  %v928_v40 = vrot.slane %v927_v58, 1 }
 0x41e   : > { %v939_v44 = vadd.f32 %v938_v10, %v937_v37  ;;  %v934_v0 = vadd.f32 %v933_v50, %v932_v11  ;;  %v1082_v10 = vld [vmem:[%s2071_s7 + $0x8] sm:$0xff]  ;;  %v1364_v50 = vld [vmem:[%s2070_s6] ss:$0 sm:$0xff] }
 0x41f   : > { %v944_v42 = vsel %vm439_vm0, %v912_v9, 0.0  ;;  %v929_v20 = vadd.f32 %v928_v40, %v927_v58  ;;  %v1471_v43 = vpack.c.bf16 %v1082_v10, %v1081_v38 }
 0x420   : > { %v945_v45 = vrot.slane %v944_v42, 4  ;;  %v896_v46 = vpop.permute.xlu0 %895  ;;  %v940_v54 = vrot.slane %v939_v44, 2  ;;  %v935_v61 = vrot.slane %v934_v0, 1 }
 0x421   : > { %v913_v48 = vmul.f32 %v896_v46, %v1823_v14  ;;  %v993_v29 = vsel %vm659_vm2, %v929_v20, %v922_v25  ;;  %v1084_v46 = vld [vmem:[%s2071_s7 + $0x18] sm:$0xff] }
 0x422   : > { %v946_v49 = vadd.f32 %v945_v45, %v944_v42  ;;  %v941_v3 = vadd.f32 %v940_v54, %v939_v44  ;;  %v936_v24 = vadd.f32 %v935_v61, %v934_v0  ;;  %v1083_v45 = vld [vmem:[%s2071_s7 + $0x10] sm:$0xff] }
 0x423   : > { %v951_v52 = vsel %vm439_vm0, %v913_v48, 0.0  ;;  %v1474_v12 = vpack.c.bf16 %v1084_v46, %v1083_v45 }
 0x424   : > { %v952_v56 = vrot.slane %v951_v52, 4  ;;  %v901_v57 = vpop.permute.xlu0 %900  ;;  %v947_v13 = vrot.slane %v946_v49, 2  ;;  %v942_v55 = vrot.slane %v941_v3, 1  ;;  %v994_v36 = vsel %vm661_vm3, %v936_v24, %v993_v29 }
 0x425   : > { %v914_v63 = vmul.f32 %v901_v57, %v1825_v15  ;;  %v1211_v24 = vstv %s1368_s15  ;;  %s1654_s15 = smov [#allocation5]  }
 0x426   : > { %v953_v62 = vadd.f32 %v952_v56, %v951_v52  ;;  %v948_v2 = vadd.f32 %v947_v13, %v946_v49  ;;  %v1080_v49 = vld [vmem:[%s411_s22] sm:$0xff]  ;;  %s405_s22 = sand.u32 1, %s1637_s18  }
 0x427   : > { %v958_v1 = vsel %vm439_vm0, %v914_v63, 0.0  ;;  %s1350_s24 = sshll.u32 %s405_s22, 3  ;;  %s1248_s21 = scalar_lea.sflag [#allocation3], %s405_s22 }
 0x428   : > { %v954_v14 = vrot.slane %v953_v62, 2  ;;  %v959_v60 = vrot.slane %v958_v1, 4  ;;  %v906_v4 = vpop.permute.xlu0 %905  ;;  %v949_v19 = vrot.slane %v948_v2, 1  ;;  %s407_s30 = scalar_lea.vmem [#allocation5], %s1350_s24 }
 0x429   : > { %v915_v5 = vmul.f32 %v906_v4, %v1831_v16  ;;  %v943_v16 = vadd.f32 %v942_v55, %v941_v3  ;;  %s1261_s12 = sshll.u32 %s407_s30, 4  ;;  %s2024_s12 = int_to_ptr.vmem [resolvable:$true] %s1261_s12 }
 0x42a   : > { %v955_v47 = vadd.f32 %v954_v14, %v953_v62  ;;  %v960_v6 = vadd.f32 %v959_v60, %v958_v1  ;;  %v950_v28 = vadd.f32 %v949_v19, %v948_v2  ;;  %v1172_v14 = vld [vmem:[%s2073_s9] sm:$0xf] }
 0x42b   : > { %v965_v15 = vsel %vm439_vm0, %v915_v5, 0.0  ;;  %v995_v39 = vsel %vm663_vm4, %v943_v16, %v994_v36  ;;  %v1184_v60 = vrot.slane %v1172_v14, %v1874_v33  ;;  %v1204_v33 = vrot.slane %v1172_v14, %v1880_v35 }
 0x42c   : > { %v961_v8 = vrot.slane %v960_v6, 2  ;;  %v966_v17 = vrot.slane %v965_v15, 4  ;;  %v956_v21 = vrot.slane %v955_v47, 1  ;;  %v996_v41 = vsel %vm665_vm5, %v950_v28, %v995_v39 }
 0x42e   : > { %v962_v22 = vadd.f32 %v961_v8, %v960_v6  ;;  %v967_v23 = vadd.f32 %v966_v17, %v965_v15  ;;  %v957_v30 = vadd.f32 %v956_v21, %v955_v47  ;;  %v1176_v47 = vrot.slane %v1172_v14, %v1871_v32 }
 0x42f   : > { %v1196_v15 = vrot.slane %v1172_v14, %v1877_v34 }
 0x430   : > { %v963_v26 = vrot.slane %v962_v22, 1  ;;  %v968_v27 = vrot.slane %v967_v23, 2  ;;  %v997_v42 = vsel %vm667_vm6, %v957_v30, %v996_v41 }
 0x432   : > { %v969_v31 = vadd.f32 %v968_v27, %v967_v23  ;;  %v964_v37 = vadd.f32 %v963_v26, %v962_v22  ;;  %v1191_v23 = vstv %s1190_s14  ;;  %s1579_s14 = scalar_lea.vmem %s2024_s12, 128 }
 0x433   : > { %p1580_p11 = scmp.ne.s32.totalorder %s2024_s12, %s1579_s14 }
 0x434   : > { %v970_v9 = vrot.slane %v969_v31, 1  ;;  %v998_v44 = vsel %vm669_vm7, %v964_v37, %v997_v42 }
 0x435   : > { %p1581_p12 = pnand %p1580_p11, %p1753_p5 }
 0x436   : > { %v971_v11 = vadd.f32 %v970_v9, %v969_v31 }
 0x437   : > { %p1582_p13 = pneg %p1581_p12 }
 0x438   : > { %v999_v48 = vsel %vm671_vm8, %v971_v11, %v998_v44 }
 0x439   : > { %1436 = vmatmul.mubr.msk.f32.vlgmr.msra.gmra.mrb[0].mxu1 %vm439_vm0, %v999_v48 }
 0x43a   : > { %1472 = vmatpush3.bf16.msra.mxu1 %v1471_v43  ;;  %1446 = vmatprep.mubr.msk.f32.mxu1 %vm1650_vm10, %v1651_v18 }
 0x43b   : > { %1473 = vmatprep.subr.bf16.mxu1 %v1649_v7  ;;  %v1366_v7 = vld [vmem:[%s2072_s8] ss:$0 sm:$0xff] }
 0x43e   : > { %1475 = vmatpush3.bf16.msra.mxu1 %v1474_v12 }
 0x441   : > { %1447 = vmatmul.mubr.msk.f32.vlgmr.msra.gmra.mrb[2].mxu1 %vm1073_vm11, %v1080_v49 }
 0x50c   : > { %v1068_v52 = vpop.f32.mrb[0].mxu1 }
 0x50d   : > { %v1069_v53 = vadd.f32 %v1364_v50, %v1068_v52  ;;  %v1437_v54 = vpop.f32.mrb[1].mxu1 }
 0x50f   : > { %v1072_v56 = vmul.f32 %v1069_v53, %v1069_v53 }
 0x511   : > { %v1074_v18 = vsel %vm1073_vm11, %v1072_v56, 0.0 }
 0x512   : > { %1075 = vadd.xlane.f32.xlu1 %v1074_v18 }
 0x514   : > { %v1161_v57 = vpop.f32.mrb[2].mxu1 }
 0x515   : > { %v1162_v13 = vadd.f32 %v1366_v7, %v1161_v57  ;;  %v1448_v63 = vpop.f32.mrb[3].mxu1 }
 0x517   : > { %v1165_v58 = vmul.f32 %v1162_v13, %v1162_v13 }
 0x519   : > { %v1166_v62 = vsel %vm1073_vm11, %v1165_v58, 0.0 }
 0x51a   : > { %1167 = vadd.xlane.f32.xlu0 %v1166_v62 }
 0x59f   : > { %v1076_v0 = vpop.xlane.xlu1 %1075 }
 0x5a0   : > { %v1077_v1 = vmax.f32 %v1076_v0, 1e-24 }
 0x5a2   : > { %1552 = vrsqrt.f32 %v1077_v1 }
 0x5a7   : > { %v1168_v59 = vpop.xlane.xlu0 %1167 }
 0x5a8   : > { %v1169_v3 = vmax.f32 %v1168_v59, 1e-24 }
 0x5aa   : > { %1554 = vrsqrt.f32 %v1169_v3 }
 0x5ac   : > { %v1553_v4 = vpop.eup %1552 }
 0x5ad   : > { %v1079_v2 = vmul.f32 %v1553_v4, %v1069_v53 }
 0x5af   : > { %1239 = vrot.lane.b32.xlu0 %v1079_v2, %s1652_s13  ;;  %v1185_v5 = vmul.f32 %v1184_v60, %v1079_v2  ;;  %v1205_v19 = vmul.f32 %v1204_v33, %v1079_v2  ;;  %s2022_s13 = scalar_lea.hbm %s2075_s11, %s1370_s25 }
 0x5b1   : > { %v1186_v40 = vsel %vm1073_vm11, %v1185_v5, 0.0  ;;  %v1206_v20 = vsel %vm1073_vm11, %v1205_v19, 0.0 }
 0x5b2   : > { %1187 = vadd.xlane.f32.xlu1 %v1186_v40 }
 0x5b4   : > { %v1555_v6 = vpop.eup %1554 }
 0x5b5   : > { %v1171_v61 = vmul.f32 %v1555_v6, %v1162_v13 }
 0x5b7   : > { %v1177_v51 = vmul.f32 %v1176_v47, %v1171_v61  ;;  %v1197_v8 = vmul.f32 %v1196_v15, %v1171_v61 }
 0x5b9   : > { %v1178_v55 = vsel %vm1073_vm11, %v1177_v51, 0.0  ;;  %v1198_v17 = vsel %vm1073_vm11, %v1197_v8, 0.0 }
 0x5ba   : > { %1179 = vadd.xlane.f32.xlu1 %v1178_v55 }
 0x5be   : > { %1199 = vadd.xlane.f32.xlu1 %v1198_v17 }
 0x5c2   : > { %1207 = vadd.xlane.f32.xlu1 %v1206_v20 }
 0x621   : > { %v1240_v50 = vpop.permute.xlu0 %1239 }
 0x63f   : > { %v1188_v21 = vpop.xlane.xlu1 %1187 }
 0x647   : > { %v1180_v32 = vpop.xlane.xlu1 %1179 }
 0x648   : > { %v1189_v34 = vadd.f32 %v1188_v21, %v1180_v32 }
 0x64a   : > { %v1192_v26 = vadd.f32 %v1191_v23, %v1189_v34 }
 0x64b   : > { %v1200_v22 = vpop.xlane.xlu1 %1199 }
 0x64f   : > { %v1208_v25 = vpop.xlane.xlu1 %1207 }
 0x650   : > { %v1209_v16 = vadd.f32 %v1208_v25, %v1200_v22 }
 0x652   : > { %v1212_v35 = vadd.f32 %v1211_v24, %v1209_v16 }
 0x654   : > { %v1213_v27 = vmax.f32 %v1192_v26, %v1212_v35 }
 0x656   : > { %v1214_v28 = vsub.f32 %v1192_v26, %v1213_v27  ;;  %v1217_v29 = vsub.f32 %v1212_v35, %v1213_v27 }
 0x658   : > { %v1215_v30 = vmul.f32 1.442695, %v1214_v28  ;;  %v1218_v31 = vmul.f32 1.442695, %v1217_v29 }
 0x65a   : > { %1556 = vpow2.f32 %v1215_v30 }
 0x65b   : > { %1558 = vpow2.f32 %v1218_v31 }
 0x664   : > { %v1557_v36 = vpop.eup %1556 }
 0x665   : > { %v1559_v37 = vpop.eup %1558 }
 0x666   : > { %v1220_v38 = vadd.f32 %v1559_v37, %v1557_v36 }
 0x668   : > { %1560 = vrcp.f32 %v1220_v38 }
 0x672   : > { %v1561_v10 = vpop.eup %1560 }
 0x673   : > { %v1222_v39 = vmul.f32 %v1561_v10, %v1557_v36  ;;  %v1223_v9 = vmul.f32 %v1561_v10, %v1559_v37 }
 0x675   : > { %v1224_v41 = vmul.f32 %v1222_v39, %v1171_v61  ;;  %v1225_v11 = vmul.f32 %v1223_v9, %v1079_v2 }
 0x677   : > { %v1226_v42 = vadd.f32 %v1225_v11, %v1224_v41 }
 0x679   : > { %v1227_v43 = vmul.f32 %v1226_v42, %v1226_v42 }
 0x67b   : > { %v1228_v44 = vsel %vm1073_vm11, %v1227_v43, 0.0 }
 0x67c   : > { %1229 = vadd.xlane.f32.xlu1 %v1228_v44 }
 0x68d   : > { %1235 = vrot.lane.b32.xlu1 %v1171_v61, %s1653_s16  ;;  %s1583_s16 = sshll.u32 %s1654_s15, 4  ;;  %s1584_s16 = int_to_ptr.vmem [resolvable:$false] %s1583_s16 }
 0x68e   : > { %s1585_s24 = scalar_lea.vmem %s1584_s16, 256  ;;  %p1586_p0 = scmp.lt.s32.totalorder %s2024_s12, %s1584_s16 }
 0x68f   : > { %p1587_p1 = scmp.lt.s32.totalorder %s1585_s24, %s1579_s14 }
 0x691   : > { %p1588_p2 = por %p1587_p1, %p1586_p0 }
 0x693   : > { %p1589_p3 = pnand %p1588_p2, %p1582_p13 }
 0x709   : > { %v1230_v45 = vpop.xlane.xlu1 %1229 }
 0x70a   : > { %v1231_v46 = vmax.f32 %v1230_v45, 1e-24 }
 0x70c   : > { %1562 = vrsqrt.f32 %v1231_v46 }
 0x70d   : > { %v1236_v49 = vpop.permute.xlu1 %1235 }
 0x716   : > { %v1563_v48 = vpop.eup %1562 }
 0x717   : > { %v1233_v12 = vmul.f32 %v1563_v48, %v1226_v42 }
 0x719   : > { %v1242_v52 = vsel %vm1073_vm11, %v1233_v12, %v1236_v49 }
 0x71a   : > { %v1243_v53 = vsel %vm592_vm1, %v1242_v52, %v1240_v50 }
 0x71b   : > { %v1245_v54 = vsel %vm1244_vm12, %v1243_v53, 0.0 }
 0x71c   : > { %1246 = vst [vmem:[%s407_s30] sm:$0xff] %v1245_v54 }
 0x71d   : > { %1592 = shalt.err (!%p1589_p3)
}
 0x71e   : > { %s1593_s22 = scalar_lea.hbm %s2022_s13, 128  ;;  %s1597_s10 = scalar_lea.hbm %s2075_s11, 256 }
 0x71f   : > { %p1594_p4 = scmp.ne.s32.totalorder %s2022_s13, %s1593_s22  ;;  %p1598_p9 = scmp.lt.u32.totalorder %s2022_s13, %s2075_s11 }
 0x720   : > { %p1599_p10 = scmp.lt.u32.totalorder %s1597_s10, %s1593_s22  ;;  %p1601_p12 = scmp.lt.u32.totalorder %s1593_s22, %s2022_s13 }
 0x721   : > { %p1595_p7 = pnand %p1594_p4, %p1753_p5 }
 0x722   : > { %p1600_p11 = por %p1599_p10, %p1598_p9 }
 0x723   : > { %p1596_p8 = pneg %p1595_p7 }
 0x724   : > { %p1602_p13 = por %p1601_p12, %p1600_p11 }
 0x726   : > { %p1603_p0 = pnand %p1602_p13, %p1596_p8 }
 0x728   : > { %1606 = shalt.err (!%p1603_p0)
}
 0x729   : > { %1480 = dma.vmem_to_hbm [thread:$0]  (%p1753_p5), %s2024_s12, 128, %s2022_s13, %s1248_s21  }
 0x72a PF: > { %p1492_p1 = scmp.ge.s32.totalorder %s1645_s20, 2  ;;  %s1273_s14 = sand.u32 1, %s1633_s17  }
 0x72b   : > { %s1274_s16 = scalar_lea.sflag [#allocation3], %s1273_s14 }
 0x72c   : > { %p1487_p2 = pnand %p1492_p1, %p1757_p6 }
 0x72e   : > { %1628 = dma.done.wait (!%p1487_p2), %s1274_s16, 128  }
 0x72f   : > { %1630 = vsyncadd (!%p1487_p2), %s1274_s16, 4294967168  ;;  %p22_p3 = scmp.ge.s32.totalorder %s1740_s23, 4   ;;  %s2081_s17 = smov %s1637_s18 }
 0x730   : > { %s2082_s18 = smov %s1641_s19  ;;  %s2083_s19 = smov %s1751_s26 }
 0x731   : > { %s2084_s20 = smov %s1740_s23  ;;  %24 = sbr.rel (!%p22_p3) target bundleno = 6 (0x6), region = 107 }
 0x738   :  { %1279 = vsyncpa [#allocation3], 1 }
 0x739   :  { %1281 = vsyncpa [#allocation3 + $0x1], 1 }
 0x73a   :  { %1282 = vsyncpa [#allocation4], 1 }
 0x73b   :  { %1284 = vsyncpa [#allocation4 + $0x1], 1 }

</bundles_post_ra>
